<compile_context>
chip_gen: v7x
topology: tpu7x:2x2x1
jax: 0.10.0
libtpu: 0.0.40
codegen_flags: <defaults>
</compile_context>

<pallas_src>
import functools

import jax
import jax.numpy as jnp
import numpy as np
from jax.experimental import pallas as pl
from jax.experimental.pallas import tpu as pltpu


# ---------------------------------------------------------------------------
# Integer div/mod by trace-time constants (pow-of-2 shift/mask fast path so the
# default 16x16 config never needs a vector integer divide).
# ---------------------------------------------------------------------------
def _idiv_const(x, d):
    if d & (d - 1) == 0:
        return x >> (d.bit_length() - 1)
    return x // d   # TODO(synk): non-pow2 H/W falls back to vector integer div.


def _imod_const(x, d):
    if d & (d - 1) == 0:
        return x & (d - 1)
    return x % d


# ---------------------------------------------------------------------------
# Kernel 1: fc head for the whole batch (single invocation, no grid).
#   theta = Tanh(Linear(Tanh(Linear(flatten(img)))))   (Dropout = identity)
# ---------------------------------------------------------------------------
def fc_kernel(x_ref, w1_ref, b1_ref, w2_ref, b2_ref, theta_ref):
    h = jnp.tanh(jnp.dot(x_ref[...], w1_ref[...],
                         preferred_element_type=jnp.float32) + b1_ref[...])
    # nn.Dropout is the identity at inference time.
    theta_ref[...] = jnp.tanh(jnp.dot(h, w2_ref[...],
                                      preferred_element_type=jnp.float32)
                              + b2_ref[...])


# ---------------------------------------------------------------------------
# Kernel 2: affine_grid + grid_sample for the whole batch, one output-pixel
# tile per grid step.  theta lives in SMEM; the image slab (B*C*H, W) stays
# resident in VMEM; the output tile is (B*C, TILE_N): 8 sublanes, lane-dense.
# ---------------------------------------------------------------------------
def sampler_kernel(theta_ref, img_ref, out_ref, *, B, C, H, W, TILE_N):
    n0 = pl.program_id(0) * TILE_N                                   # pixel offset

    # ---- batch-independent tables for this pixel tile (once per step) ------
    p = jax.lax.broadcasted_iota(jnp.int32, (1, TILE_N), 1) + n0     # out pixel id
    ox = _imod_const(p, W).astype(jnp.float32)
    oy = _idiv_const(p, W).astype(jnp.float32)
    xn = (2.0 * ox + 1.0) * (1.0 / W) - 1.0                          # (1, TILE_N)
    yn = (2.0 * oy + 1.0) * (1.0 / H) - 1.0

    xg = jax.lax.broadcasted_iota(jnp.int32, (W, TILE_N), 0)         # x row ids
    CH = C * H
    yg = _imod_const(jax.lax.broadcasted_iota(jnp.int32, (CH, TILE_N), 0), H)

    # ---- per-batch separable bilinear sampling (static unroll over B) ------
    prods = []
    for b in range(B):
        t00 = theta_ref[b, 0]
        t01 = theta_ref[b, 1]
        t02 = theta_ref[b, 2]
        t10 = theta_ref[b, 3]
        t11 = theta_ref[b, 4]
        t12 = theta_ref[b, 5]

        # affine_grid (align_corners=False)
        gx = t00 * xn + t01 * yn + t02                               # (1, TILE_N)
        gy = t10 * xn + t11 * yn + t12

        # grid_sample unnormalize (align_corners=False)
        ix = (gx + 1.0) * (0.5 * W) - 0.5
        iy = (gy + 1.0) * (0.5 * H) - 0.5
        ix0 = jnp.floor(ix)
        iy0 = jnp.floor(iy)
        wx1 = ix - ix0
        wx0 = 1.0 - wx1
        wy1 = iy - iy0
        wy0 = 1.0 - wy1
        ix0i = ix0.astype(jnp.int32)
        iy0i = iy0.astype(jnp.int32)

        # Separable bilinear factors; zeros padding is automatic because an
        # out-of-range corner index matches no in-range row.
        Bx = (jnp.where(xg == ix0i, wx0, 0.0)
              + jnp.where(xg == ix0i + 1, wx1, 0.0))                 # (W, TILE_N)
        Ay = (jnp.where(yg == iy0i, wy0, 0.0)
              + jnp.where(yg == iy0i + 1, wy1, 0.0))                 # (C*H, TILE_N)

        img_b = img_ref[b * CH:(b + 1) * CH, :]                      # (C*H, W)
        tmp = jnp.dot(img_b, Bx, preferred_element_type=jnp.float32)
        prods.append(tmp * Ay)                                       # (C*H, TILE_N)

    prod_all = jnp.concatenate(prods, axis=0)                        # (B*C*H, TILE_N)

    # ---- per-(batch, channel) sum over the H y-rows: one block-diagonal
    # selector matmul -> a single full-tile (B*C, TILE_N) store --------------
    BCH = B * CH
    rsel = _idiv_const(jax.lax.broadcasted_iota(jnp.int32, (B * C, BCH), 1), H)
    csel = jax.lax.broadcasted_iota(jnp.int32, (B * C, BCH), 0)
    S = (rsel == csel).astype(jnp.float32)                           # (B*C, B*C*H)
    out_ref[...] = jnp.dot(S, prod_all, preferred_element_type=jnp.float32)


# ---------------------------------------------------------------------------
# Parameters (deterministic, in-script -- mirrors LocalNetwork.__init__)
# ---------------------------------------------------------------------------
def init_params(key, C, H, W):
    D = C * H * W
    k1, k2 = jax.random.split(key)
    lim = 1.0 / np.sqrt(D)
    w1 = jax.random.uniform(k1, (D, 20), jnp.float32, -lim, lim)
    b1 = jax.random.uniform(k2, (1, 20), jnp.float32, -lim, lim)
    w2 = jnp.zeros((20, 6), jnp.float32)                   # nn.init.constant(..., 0)
    b2 = jnp.array([[1.0, 0.0, 0.0, 0.0, 1.0, 0.0]], jnp.float32)
    return {"w1": w1, "b1": b1, "w2": w2, "b2": b2}


# ---------------------------------------------------------------------------
# Wrapper
# ---------------------------------------------------------------------------
def _pick_tile_n(N):
    """Lane-dense output tile width: >= 2 tiles when divisibility allows (keeps
    both v7x TensorCores busy), capped at 512 lanes to bound the (C*H + W,
    TILE_N) intermediates as H*W grows.  Falls back to the full width."""
    for t in (512, 384, 256, 128):
        if N % t == 0 and N // t >= 2:
            return t
    return N


def local_network_forward(img, params):
    B, C, H, W = img.shape
    N = H * W
    D = C * N

    # ---- fc head: theta for the whole batch (one tiny Pallas call) ---------
    theta = pl.pallas_call(
        fc_kernel,
        out_shape=jax.ShapeDtypeStruct((B, 6), jnp.float32),
    )(img.reshape(B, D), params["w1"], params["b1"], params["w2"], params["b2"])

    # ---- sampler: whole batch per step, grid over output-pixel tiles -------
    tile_n = _pick_tile_n(N)
    grid = (N // tile_n,)
    kernel = functools.partial(sampler_kernel, B=B, C=C, H=H, W=W, TILE_N=tile_n)

    out = pl.pallas_call(
        kernel,
        out_shape=jax.ShapeDtypeStruct((B * C, N), jnp.float32),
        grid=grid,
        in_specs=[
            pl.BlockSpec(memory_space=pltpu.MemorySpace.SMEM),       # theta (B, 6)
            pl.BlockSpec((B * C * H, W), lambda n: (0, 0)),          # image slab (resident)
        ],
        out_specs=pl.BlockSpec((B * C, tile_n), lambda n: (0, n)),   # lane-dense tile
        compiler_params=pltpu.CompilerParams(
            dimension_semantics=("parallel",)),                      # N tiles across cores
    )(theta, img.reshape(B * C * H, W))

    return out.reshape(B, C, H, W)


# ---------------------------------------------------------------------------
# Pure-JAX reference (same math) used as a sanity check.
# ---------------------------------------------------------------------------
def ref_forward(img, params):
    B, C, H, W = img.shape
    x = img.reshape(B, -1)
    h = jnp.tanh(x @ params["w1"] + params["b1"])
    theta = jnp.tanh(h @ params["w2"] + params["b2"])                 # (B, 6)

    ys = (2.0 * jnp.arange(H, dtype=jnp.float32) + 1.0) / H - 1.0
    xs = (2.0 * jnp.arange(W, dtype=jnp.float32) + 1.0) / W - 1.0
    yn, xn = jnp.meshgrid(ys, xs, indexing="ij")                      # (H, W)
    t = theta.reshape(B, 2, 3)
    gx = (t[:, 0, 0, None, None] * xn[None] + t[:, 0, 1, None, None] * yn[None]
          + t[:, 0, 2, None, None])
    gy = (t[:, 1, 0, None, None] * xn[None] + t[:, 1, 1, None, None] * yn[None]
          + t[:, 1, 2, None, None])
    ix = ((gx + 1.0) * W - 1.0) / 2.0
    iy = ((gy + 1.0) * H - 1.0) / 2.0
    ix0 = jnp.floor(ix)
    iy0 = jnp.floor(iy)
    wx1 = ix - ix0
    wx0 = 1.0 - wx1
    wy1 = iy - iy0
    wy0 = 1.0 - wy1
    ix0i = ix0.astype(jnp.int32)
    iy0i = iy0.astype(jnp.int32)
    imgf = img.reshape(B, C, H * W)

    def corner(yci, xci, w):
        valid = (xci >= 0) & (xci < W) & (yci >= 0) & (yci < H)
        ycc = jnp.clip(yci, 0, H - 1)
        xcc = jnp.clip(xci, 0, W - 1)
        q = (ycc * W + xcc).reshape(B, 1, H * W)
        v = jnp.take_along_axis(imgf, q, axis=2).reshape(B, C, H, W)
        return jnp.where(valid[:, None], w[:, None] * v, 0.0)

    return (corner(iy0i, ix0i, wy0 * wx0) + corner(iy0i, ix0i + 1, wy0 * wx1)
            + corner(iy0i + 1, ix0i, wy1 * wx0) + corner(iy0i + 1, ix0i + 1, wy1 * wx1))


if __name__ == "__main__":
    # cfg: channel=4, height=16, width=16; batch=2
    B, C, H, W = 2, 4, 16, 16
    key = jax.random.PRNGKey(0)
    kimg, kparam = jax.random.split(key)
    img = jax.random.normal(kimg, (B, C, H, W), jnp.float32)
    params = init_params(kparam, C, H, W)

    out = local_network_forward(img, params)
    out = jax.block_until_ready(out)
    assert out.shape == (B, C, H, W) and out.dtype == jnp.float32

    ref = ref_forward(img, params)
    err = float(jnp.max(jnp.abs(out - ref)))
    if not err < 1e-3:
        raise AssertionError(f"mismatch vs reference: max abs err {err}")

    print("KERNEL_OK")
</pallas_src>

<mosaic_0001>
module attributes {stable_mosaic.version = 11 : i64} {
  func.func @fc_kernel(%arg0: memref<2x1024xf32, #tpu.memory_space<vmem>>, %arg1: memref<1024x20xf32, #tpu.memory_space<vmem>>, %arg2: memref<1x20xf32, #tpu.memory_space<vmem>>, %arg3: memref<20x6xf32, #tpu.memory_space<vmem>>, %arg4: memref<1x6xf32, #tpu.memory_space<vmem>>, %arg5: memref<2x6xf32, #tpu.memory_space<vmem>>) attributes {dimension_semantics = [], scalar_prefetch = 0 : i64, scratch_operands = 0 : i64, tpu.core_type = #tpu.core_type<tc>} {
    %c0 = arith.constant 0 : index
    %c0_0 = arith.constant 0 : index
    %0 = vector.load %arg0[%c0, %c0_0] : memref<2x1024xf32, #tpu.memory_space<vmem>>, vector<2x1024xf32>
    %c0_1 = arith.constant 0 : index
    %c0_2 = arith.constant 0 : index
    %1 = vector.load %arg1[%c0_1, %c0_2] : memref<1024x20xf32, #tpu.memory_space<vmem>>, vector<1024x20xf32>
    %cst = arith.constant dense<0.000000e+00> : vector<2x20xf32>
    %2 = tpu.matmul %0, %1, %cst {dimension_numbers = #tpu.dot_dimension_numbers<[1], [0], [0], [1], [0, 0, 1, 1], [], []>} : vector<2x1024xf32>, vector<1024x20xf32>, vector<2x20xf32> -> vector<2x20xf32>
    %c0_3 = arith.constant 0 : index
    %c0_4 = arith.constant 0 : index
    %3 = vector.load %arg2[%c0_3, %c0_4] : memref<1x20xf32, #tpu.memory_space<vmem>>, vector<1x20xf32>
    %4 = vector.broadcast %3 : vector<1x20xf32> to vector<2x20xf32>
    %5 = arith.addf %2, %4 : vector<2x20xf32>
    %6 = math.tanh %5 : vector<2x20xf32>
    %c0_5 = arith.constant 0 : index
    %c0_6 = arith.constant 0 : index
    %7 = vector.load %arg3[%c0_5, %c0_6] : memref<20x6xf32, #tpu.memory_space<vmem>>, vector<20x6xf32>
    %cst_7 = arith.constant dense<0.000000e+00> : vector<2x6xf32>
    %8 = tpu.matmul %6, %7, %cst_7 {dimension_numbers = #tpu.dot_dimension_numbers<[1], [0], [0], [1], [0, 0, 1, 1], [], []>} : vector<2x20xf32>, vector<20x6xf32>, vector<2x6xf32> -> vector<2x6xf32>
    %c0_8 = arith.constant 0 : index
    %c0_9 = arith.constant 0 : index
    %9 = vector.load %arg4[%c0_8, %c0_9] : memref<1x6xf32, #tpu.memory_space<vmem>>, vector<1x6xf32>
    %10 = vector.broadcast %9 : vector<1x6xf32> to vector<2x6xf32>
    %11 = arith.addf %8, %10 : vector<2x6xf32>
    %12 = math.tanh %11 : vector<2x6xf32>
    %c0_10 = arith.constant 0 : index
    %c0_11 = arith.constant 0 : index
    %13 = vector.load %arg5[%c0_10, %c0_11] : memref<2x6xf32, #tpu.memory_space<vmem>>, vector<2x6xf32>
    tpu.vector_store %arg5[%c0_10, %c0_11], %12 {strides = array<i32>} : memref<2x6xf32, #tpu.memory_space<vmem>>, vector<2x6xf32>,
    return
  }
}

</mosaic_0001>

<bundles_post_ra>
// kernel: tpu_custom_call.1
= control target key start
LH: loop header
LB: loop body
LE: loop exit
PB: predicated region body
PF: predicated region fallthrough
CT: control target
= control target key end

     0   :  { %v911_v47 = vmov 1983009808   ;;  %v164_v49 = vlaneseq  ;;  %s1374_s0 = inlined_call_operand.vmem [shape: f32[2,1024], index: 0, kind: input, shape index: {}]   ;;  %s1375_s1 = inlined_call_operand.vmem [shape: f32[1024,20], index: 1, kind: input, shape index: {}]   ;;  %s1376_s2 = inlined_call_operand.vmem [shape: f32[1,20], index: 2, kind: input, shape index: {}]   ;;  %s1377_s3 = inlined_call_operand.vmem [shape: f32[20,6], index: 3, kind: input, shape index: {}]   ;;  %s1378_s4 = inlined_call_operand.vmem [shape: f32[1,6], index: 4, kind: input, shape index: {}]   ;;  %s1379_s5 = inlined_call_operand.hbm [shape: f32[2,6], index: 5, kind: output, shape index: {}]  }
   0x1   :  { %v39_v0 = vld [vmem:[%s1375_s1 + $0x80] sm:$0xff]  ;;  %v40_v1 = vld [vmem:[%s1375_s1 + $0x88] sm:$0xff]  ;;  %v41_v11 = vld [vmem:[%s1375_s1 + $0x90] sm:$0xff]  ;;  %v162_v48 = vunpack.c.l.s4 %v911_v47 }
   0x2   :  { %v23_v2 = vld [vmem:[%s1375_s1] sm:$0xff]  ;;  %v745_v3 = vpack.c.bf16 %v40_v1, %v39_v0  ;;  %v24_v4 = vld [vmem:[%s1375_s1 + $0x8] sm:$0xff]  ;;  %v42_v13 = vld [vmem:[%s1375_s1 + $0x98] sm:$0xff]  ;;  %v165_v0 = vshrl.u32 %v164_v49, 7 }
   0x3   :  { %v71_v5 = vld [vmem:[%s1375_s1 + $0x180] sm:$0xff]  ;;  %v72_v6 = vld [vmem:[%s1375_s1 + $0x188] sm:$0xff]  ;;  %v747_v7 = vpack.c.bf16 %v24_v4, %v23_v2  ;;  %v25_v14 = vld [vmem:[%s1375_s1 + $0x10] sm:$0xff]  ;;  %v749_v16 = vpack.c.bf16 %v42_v13, %v41_v11  ;;  %v163_v63 = vunpack.c.0.s8 %v162_v48 }
   0x4   :  { %v777_v8 = vpack.c.bf16 %v72_v6, %v71_v5  ;;  %v55_v9 = vld [vmem:[%s1375_s1 + $0x100] sm:$0xff]  ;;  %v56_v10 = vld [vmem:[%s1375_s1 + $0x108] sm:$0xff]  ;;  %746 = vmatprep.subr.bf16.mxu0 %v745_v3  ;;  %v26_v15 = vld [vmem:[%s1375_s1 + $0x18] sm:$0xff] }
   0x5   :  { %v779_v12 = vpack.c.bf16 %v56_v10, %v55_v9  ;;  %748 = vmatpush3.bf16.msra.mxu0 %v747_v7  ;;  %v751_v17 = vpack.c.bf16 %v26_v15, %v25_v14  ;;  %v73_v18 = vld [vmem:[%s1375_s1 + $0x190] sm:$0xff]  ;;  %v74_v19 = vld [vmem:[%s1375_s1 + $0x198] sm:$0xff]  ;;  %v43_v23 = vld [vmem:[%s1375_s1 + $0xa0] sm:$0xff]  ;;  %v1096_v13 = vsub.s32 %v163_v63, %v165_v0 }
   0x6   :  { %778 = vmatprep.subr.bf16.mxu1 %v777_v8  ;;  %v57_v20 = vld [vmem:[%s1375_s1 + $0x110] sm:$0xff]  ;;  %v781_v21 = vpack.c.bf16 %v74_v19, %v73_v18  ;;  %v58_v22 = vld [vmem:[%s1375_s1 + $0x118] sm:$0xff]  ;;  %v44_v24 = vld [vmem:[%s1375_s1 + $0xa8] sm:$0xff]  ;;  %750 = vmatprep.subr.bf16.mxu0 %v749_v16 }
   0x7   :  { %780 = vmatpush3.bf16.msra.mxu1 %v779_v12  ;;  %v783_v25 = vpack.c.bf16 %v58_v22, %v57_v20  ;;  %v753_v26 = vpack.c.bf16 %v44_v24, %v43_v23  ;;  %v27_v27 = vld [vmem:[%s1375_s1 + $0x20] sm:$0xff]  ;;  %v28_v28 = vld [vmem:[%s1375_s1 + $0x28] sm:$0xff]  ;;  %v45_v35 = vld [vmem:[%s1375_s1 + $0xb0] sm:$0xff] }
   0x8   :  { %v75_v29 = vld [vmem:[%s1375_s1 + $0x1a0] sm:$0xff]  ;;  %782 = vmatprep.subr.bf16.mxu1 %v781_v21  ;;  %v76_v30 = vld [vmem:[%s1375_s1 + $0x1a8] sm:$0xff]  ;;  %v755_v33 = vpack.c.bf16 %v28_v28, %v27_v27  ;;  %v46_v36 = vld [vmem:[%s1375_s1 + $0xb8] sm:$0xff] }
   0x9   :  { %v59_v31 = vld [vmem:[%s1375_s1 + $0x120] sm:$0xff]  ;;  %v60_v32 = vld [vmem:[%s1375_s1 + $0x128] sm:$0xff]  ;;  %752 = vmatpush3.bf16.msra.mxu0 %v751_v17  ;;  %v785_v34 = vpack.c.bf16 %v76_v30, %v75_v29  ;;  %v29_v37 = vld [vmem:[%s1375_s1 + $0x30] sm:$0xff]  ;;  %v757_v39 = vpack.c.bf16 %v46_v36, %v45_v35 }
   0xa   :  { %754 = vmatprep.subr.bf16.mxu0 %v753_v26  ;;  %v787_v38 = vpack.c.bf16 %v60_v32, %v59_v31  ;;  %v30_v40 = vld [vmem:[%s1375_s1 + $0x38] sm:$0xff]  ;;  %v77_v41 = vld [vmem:[%s1375_s1 + $0x1b0] sm:$0xff]  ;;  %v47_v46 = vld [vmem:[%s1375_s1 + $0xc0] sm:$0xff] }
   0xb   :  { %784 = vmatpush3.bf16.msra.mxu1 %v783_v25  ;;  %v78_v42 = vld [vmem:[%s1375_s1 + $0x1b8] sm:$0xff]  ;;  %v61_v44 = vld [vmem:[%s1375_s1 + $0x130] sm:$0xff]  ;;  %v48_v50 = vld [vmem:[%s1375_s1 + $0xc8] sm:$0xff]  ;;  %v759_v51 = vpack.c.bf16 %v30_v40, %v29_v37 }
   0xc   :  { %786 = vmatprep.subr.bf16.mxu1 %v785_v34  ;;  %v789_v43 = vpack.c.bf16 %v78_v42, %v77_v41  ;;  %v62_v45 = vld [vmem:[%s1375_s1 + $0x138] sm:$0xff]  ;;  %v79_v52 = vld [vmem:[%s1375_s1 + $0x1c0] sm:$0xff]  ;;  %v80_v53 = vld [vmem:[%s1375_s1 + $0x1c8] sm:$0xff]  ;;  %v761_v55 = vpack.c.bf16 %v48_v50, %v47_v46 }
   0xd   :  { %756 = vmatpush3.bf16.msra.mxu0 %v755_v33  ;;  %v791_v54 = vpack.c.bf16 %v62_v45, %v61_v44  ;;  %v31_v56 = vld [vmem:[%s1375_s1 + $0x40] sm:$0xff]  ;;  %v32_v57 = vld [vmem:[%s1375_s1 + $0x48] sm:$0xff]  ;;  %v793_v59 = vpack.c.bf16 %v80_v53, %v79_v52  ;;  %v49_v61 = vld [vmem:[%s1375_s1 + $0xd0] sm:$0xff] }
   0xe   :  { %758 = vmatprep.subr.bf16.mxu0 %v757_v39  ;;  %v63_v58 = vld [vmem:[%s1375_s1 + $0x140] sm:$0xff]  ;;  %v64_v60 = vld [vmem:[%s1375_s1 + $0x148] sm:$0xff]  ;;  %v50_v62 = vld [vmem:[%s1375_s1 + $0xd8] sm:$0xff]  ;;  %v763_v3 = vpack.c.bf16 %v32_v57, %v31_v56 }
   0xf   :  { %788 = vmatpush3.bf16.msra.mxu1 %v787_v38  ;;  %v81_v1 = vld [vmem:[%s1375_s1 + $0x1d0] sm:$0xff]  ;;  %v82_v2 = vld [vmem:[%s1375_s1 + $0x1d8] sm:$0xff]  ;;  %v795_v4 = vpack.c.bf16 %v64_v60, %v63_v58  ;;  %v765_v5 = vpack.c.bf16 %v50_v62, %v49_v61  ;;  %v51_v11 = vld [vmem:[%s1375_s1 + $0xe0] sm:$0xff] }
  0x10   :  { %790 = vmatprep.subr.bf16.mxu1 %v789_v43  ;;  %v33_v6 = vld [vmem:[%s1375_s1 + $0x50] sm:$0xff]  ;;  %v34_v7 = vld [vmem:[%s1375_s1 + $0x58] sm:$0xff]  ;;  %v797_v9 = vpack.c.bf16 %v82_v2, %v81_v1  ;;  %v52_v12 = vld [vmem:[%s1375_s1 + $0xe8] sm:$0xff] }
  0x11   :  { %760 = vmatpush3.bf16.msra.mxu0 %v759_v51  ;;  %v65_v8 = vld [vmem:[%s1375_s1 + $0x150] sm:$0xff]  ;;  %v66_v10 = vld [vmem:[%s1375_s1 + $0x158] sm:$0xff]  ;;  %v83_v14 = vld [vmem:[%s1375_s1 + $0x1e0] sm:$0xff]  ;;  %v767_v16 = vpack.c.bf16 %v34_v7, %v33_v6  ;;  %v769_v19 = vpack.c.bf16 %v52_v12, %v51_v11 }
  0x12   :  { %762 = vmatprep.subr.bf16.mxu0 %v761_v55  ;;  %v84_v15 = vld [vmem:[%s1375_s1 + $0x1e8] sm:$0xff]  ;;  %v35_v17 = vld [vmem:[%s1375_s1 + $0x60] sm:$0xff]  ;;  %v799_v18 = vpack.c.bf16 %v66_v10, %v65_v8  ;;  %v53_v25 = vld [vmem:[%s1375_s1 + $0xf0] sm:$0xff] }
  0x13   :  { %792 = vmatpush3.bf16.msra.mxu1 %v791_v54  ;;  %v36_v20 = vld [vmem:[%s1375_s1 + $0x68] sm:$0xff]  ;;  %v67_v21 = vld [vmem:[%s1375_s1 + $0x160] sm:$0xff]  ;;  %v801_v23 = vpack.c.bf16 %v84_v15, %v83_v14  ;;  %v54_v26 = vld [vmem:[%s1375_s1 + $0xf8] sm:$0xff] }
  0x14   :  { %794 = vmatprep.subr.bf16.mxu1 %v793_v59  ;;  %v21_v22 = vld [vmem:[%s1374_s0] sm:$0xff]  ;;  %v68_v24 = vld [vmem:[%s1375_s1 + $0x168] sm:$0xff]  ;;  %v85_v29 = vld [vmem:[%s1375_s1 + $0x1f0] sm:$0xff]  ;;  %v771_v31 = vpack.c.bf16 %v36_v20, %v35_v17  ;;  %v773_v35 = vpack.c.bf16 %v54_v26, %v53_v25 }
  0x15   :  { %764 = vmatpush3.bf16.msra.mxu0 %v763_v3  ;;  %v167_v27 = vrot.slane %v21_v22, %v1096_v13  ;;  %v160_v28 = vcombine.high %v21_v22, %v21_v22  ;;  %v86_v30 = vld [vmem:[%s1375_s1 + $0x1f8] sm:$0xff]  ;;  %v803_v34 = vpack.c.bf16 %v68_v24, %v67_v21  ;;  %v37_v36 = vld [vmem:[%s1375_s1 + $0x70] sm:$0xff]  ;;  %v103_v41 = vld [vmem:[%s1375_s1 + $0x280] sm:$0xff] }
  0x16   :  { %766 = vmatprep.subr.bf16.mxu0 %v765_v5  ;;  %v38_v37 = vld [vmem:[%s1375_s1 + $0x78] sm:$0xff]  ;;  %v69_v38 = vld [vmem:[%s1375_s1 + $0x170] sm:$0xff]  ;;  %v805_v39 = vpack.c.bf16 %v86_v30, %v85_v29  ;;  %v104_v42 = vld [vmem:[%s1375_s1 + $0x288] sm:$0xff] }
  0x17   :  { %796 = vmatpush3.bf16.msra.mxu1 %v795_v4  ;;  %v175_v32 = vcombine.high %v167_v27, %v167_v27  ;;  %v174_v33 = vrot.slane %v160_v28, %v1096_v13  ;;  %v70_v40 = vld [vmem:[%s1375_s1 + $0x178] sm:$0xff]  ;;  %v135_v44 = vld [vmem:[%s1375_s1 + $0x380] sm:$0xff]  ;;  %v136_v45 = vld [vmem:[%s1375_s1 + $0x388] sm:$0xff]  ;;  %v775_v46 = vpack.c.bf16 %v38_v37, %v37_v36  ;;  %v809_v48 = vpack.c.bf16 %v104_v42, %v103_v41 }
  0x18   :  { %798 = vmatprep.subr.bf16.mxu1 %v797_v9  ;;  %v807_v47 = vpack.c.bf16 %v70_v40, %v69_v38  ;;  %v87_v49 = vld [vmem:[%s1375_s1 + $0x200] sm:$0xff]  ;;  %v88_v50 = vld [vmem:[%s1375_s1 + $0x208] sm:$0xff]  ;;  %v841_v52 = vpack.c.bf16 %v136_v45, %v135_v44  ;;  %v105_v54 = vld [vmem:[%s1375_s1 + $0x290] sm:$0xff] }
  0x19   :  { %768 = vmatpush3.bf16.msra.mxu0 %v767_v16  ;;  %266 = vmatprep.mubr.f32.mxu0 %v175_v32  ;;  %v176_v43 = vcombine.high %v174_v33, %v174_v33  ;;  %v119_v51 = vld [vmem:[%s1375_s1 + $0x300] sm:$0xff]  ;;  %v120_v53 = vld [vmem:[%s1375_s1 + $0x308] sm:$0xff]  ;;  %v106_v55 = vld [vmem:[%s1375_s1 + $0x298] sm:$0xff]  ;;  %v811_v58 = vpack.c.bf16 %v88_v50, %v87_v49 }
  0x1a   :  { %770 = vmatprep.subr.bf16.mxu0 %v769_v19  ;;  %v137_v56 = vld [vmem:[%s1375_s1 + $0x390] sm:$0xff]  ;;  %v138_v57 = vld [vmem:[%s1375_s1 + $0x398] sm:$0xff]  ;;  %v843_v59 = vpack.c.bf16 %v120_v53, %v119_v51  ;;  %v813_v60 = vpack.c.bf16 %v106_v55, %v105_v54  ;;  %v107_v2 = vld [vmem:[%s1375_s1 + $0x2a0] sm:$0xff] }
  0x1b   :  { %800 = vmatpush3.bf16.msra.mxu1 %v799_v18  ;;  %336 = vmatprep.mubr.f32.mxu1 %v176_v43  ;;  %v89_v61 = vld [vmem:[%s1375_s1 + $0x210] sm:$0xff]  ;;  %v90_v62 = vld [vmem:[%s1375_s1 + $0x218] sm:$0xff]  ;;  %v845_v0 = vpack.c.bf16 %v138_v57, %v137_v56  ;;  %v108_v3 = vld [vmem:[%s1375_s1 + $0x2a8] sm:$0xff] }
  0x1c   :  { %802 = vmatprep.subr.bf16.mxu1 %v801_v23  ;;  %v121_v63 = vld [vmem:[%s1375_s1 + $0x310] sm:$0xff]  ;;  %v122_v1 = vld [vmem:[%s1375_s1 + $0x318] sm:$0xff]  ;;  %v139_v4 = vld [vmem:[%s1375_s1 + $0x3a0] sm:$0xff]  ;;  %v815_v6 = vpack.c.bf16 %v90_v62, %v89_v61  ;;  %v817_v8 = vpack.c.bf16 %v108_v3, %v107_v2 }
  0x1d   :  { %772 = vmatpush3.bf16.msra.mxu0 %v771_v31  ;;  %v140_v5 = vld [vmem:[%s1375_s1 + $0x3a8] sm:$0xff]  ;;  %v847_v7 = vpack.c.bf16 %v122_v1, %v121_v63  ;;  %v91_v9 = vld [vmem:[%s1375_s1 + $0x220] sm:$0xff]  ;;  %v109_v15 = vld [vmem:[%s1375_s1 + $0x2b0] sm:$0xff] }
  0x1e   :  { %774 = vmatprep.subr.bf16.mxu0 %v773_v35  ;;  %v92_v10 = vld [vmem:[%s1375_s1 + $0x228] sm:$0xff]  ;;  %v123_v11 = vld [vmem:[%s1375_s1 + $0x320] sm:$0xff]  ;;  %v849_v12 = vpack.c.bf16 %v140_v5, %v139_v4  ;;  %v110_v16 = vld [vmem:[%s1375_s1 + $0x2b8] sm:$0xff] }
  0x1f   :  { %804 = vmatpush3.bf16.msra.mxu1 %v803_v34  ;;  %v124_v14 = vld [vmem:[%s1375_s1 + $0x328] sm:$0xff]  ;;  %v141_v17 = vld [vmem:[%s1375_s1 + $0x3b0] sm:$0xff]  ;;  %v142_v18 = vld [vmem:[%s1375_s1 + $0x3b8] sm:$0xff]  ;;  %v819_v19 = vpack.c.bf16 %v92_v10, %v91_v9  ;;  %v821_v22 = vpack.c.bf16 %v110_v16, %v109_v15 }
  0x20   :  { %806 = vmatprep.subr.bf16.mxu1 %v805_v39  ;;  %v93_v20 = vld [vmem:[%s1375_s1 + $0x230] sm:$0xff]  ;;  %v851_v21 = vpack.c.bf16 %v124_v14, %v123_v11  ;;  %v94_v23 = vld [vmem:[%s1375_s1 + $0x238] sm:$0xff]  ;;  %v853_v26 = vpack.c.bf16 %v142_v18, %v141_v17  ;;  %v112_v28 = vld [vmem:[%s1375_s1 + $0x2c8] sm:$0xff] }
  0x21   :  { %776 = vmatpush3.bf16.msra.mxu0 %v775_v46  ;;  %v125_v24 = vld [vmem:[%s1375_s1 + $0x330] sm:$0xff]  ;;  %v126_v25 = vld [vmem:[%s1375_s1 + $0x338] sm:$0xff]  ;;  %v143_v29 = vld [vmem:[%s1375_s1 + $0x3c0] sm:$0xff] }
  0x22   :  { %810 = vmatprep.subr.bf16.mxu0 %v809_v48  ;;  %v144_v30 = vld [vmem:[%s1375_s1 + $0x3c8] sm:$0xff] }
  0x23   :  { %808 = vmatpush3.bf16.msra.mxu1 %v807_v47  ;;  %v22_v31 = vld [vmem:[%s1374_s0 + $0x8] sm:$0xff] }
  0x24   :  { %842 = vmatprep.subr.bf16.mxu1 %v841_v52  ;;  %267 = vmatmul.mubr.f32.vlgmr.msra.gmra.mrb[0].mxu0 %v167_v27  ;;  %v111_v27 = vld [vmem:[%s1375_s1 + $0x2c0] sm:$0xff] }
  0x25   :  { %812 = vmatpush3.bf16.msra.mxu0 %v811_v58 }
  0x26   :  { %337 = vmatmul.mubr.f32.vlgmr.msra.gmra.mrb[0].mxu1 %v174_v33  ;;  %814 = vmatprep.subr.bf16.mxu0 %v813_v60 }
  0x27   :  { %844 = vmatpush3.bf16.msra.mxu1 %v843_v59 }
  0x28   :  { %846 = vmatprep.subr.bf16.mxu1 %v845_v0 }
  0x29   :  { %816 = vmatpush3.bf16.msra.mxu0 %v815_v6 }
  0x2a   :  { %818 = vmatprep.subr.bf16.mxu0 %v817_v8 }
  0x2b   :  { %848 = vmatpush3.bf16.msra.mxu1 %v847_v7 }
  0x2c   :  { %850 = vmatprep.subr.bf16.mxu1 %v849_v12 }
  0x2d   :  { %10 = vsyncpa [#allocation3], 0  ;;  %820 = vmatpush3.bf16.msra.mxu0 %v819_v19  ;;  %v823_v32 = vpack.c.bf16 %v94_v23, %v93_v20  ;;  %v1257_v33 = vrot.slane %v22_v31, %v1096_v13  ;;  %v177_v34 = vcombine.high %v22_v31, %v22_v31  ;;  %v855_v35 = vpack.c.bf16 %v126_v25, %v125_v24  ;;  %v95_v37 = vld [vmem:[%s1375_s1 + $0x240] sm:$0xff]  ;;  %v96_v38 = vld [vmem:[%s1375_s1 + $0x248] sm:$0xff]  ;;  %s915_s7 = smov [#allocation2]  }
  0x2e   :  { %822 = vmatprep.subr.bf16.mxu0 %v821_v22  ;;  %v825_v36 = vpack.c.bf16 %v112_v28, %v111_v27  ;;  %v127_v39 = vld [vmem:[%s1375_s1 + $0x340] sm:$0xff]  ;;  %v857_v40 = vpack.c.bf16 %v144_v30, %v143_v29  ;;  %v128_v41 = vld [vmem:[%s1375_s1 + $0x348] sm:$0xff]  ;;  %v113_v42 = vld [vmem:[%s1375_s1 + $0x2d0] sm:$0xff]  ;;  %v827_v48 = vpack.c.bf16 %v96_v38, %v95_v37  ;;  %vm913_vm0 = vmmov 0   ;;  %s580_s8 = sshll.u32 %s915_s7, 4  ;;  %s581_s8 = int_to_ptr.vmem [resolvable:$true] %s580_s8 }
  0x2f   :  { %852 = vmatpush3.bf16.msra.mxu1 %v851_v21  ;;  %v114_v43 = vld [vmem:[%s1375_s1 + $0x2d8] sm:$0xff]  ;;  %v192_v44 = vcombine.high %v1257_v33, %v1257_v33  ;;  %v191_v45 = vrot.slane %v177_v34, %v1096_v13  ;;  %v145_v46 = vld [vmem:[%s1375_s1 + $0x3d0] sm:$0xff]  ;;  %v859_v50 = vpack.c.bf16 %v128_v41, %v127_v39  ;;  %v115_v56 = vld [vmem:[%s1375_s1 + $0x2e0] sm:$0xff]  ;;  %v912_v21 = vmov 0.0|0.0   ;;  %s887_s9 = scalar_lea.vmem %s581_s8, 32  ;;  %p892_p1 = scmp.lt.s32.totalorder %s581_s8, %s581_s8 }
  0x30   :  { %854 = vmatprep.subr.bf16.mxu1 %v853_v26  ;;  %v146_v47 = vld [vmem:[%s1375_s1 + $0x3d8] sm:$0xff]  ;;  %v829_v51 = vpack.c.bf16 %v114_v43, %v113_v42  ;;  %v97_v13 = vld [vmem:[%s1375_s1 + $0x250] sm:$0xff]  ;;  %v116_v57 = vld [vmem:[%s1375_s1 + $0x2e8] sm:$0xff]  ;;  %v914_v23 = vmov 0.0   ;;  %vm497_vm1 = vcmask 1043456   ;;  %vm493_vm2 = vcmask 162816   ;;  %p888_p0 = scmp.ne.s32.totalorder %s581_s8, %s887_s9  ;;  %p893_p2 = scmp.lt.s32.totalorder %s887_s9, %s887_s9 }
  0x31   :  { %824 = vmatpush3.bf16.msra.mxu0 %v823_v32  ;;  %406 = vmatprep.mubr.f32.mxu0 %v192_v44  ;;  %v193_v49 = vcombine.high %v191_v45, %v191_v45  ;;  %v98_v52 = vld [vmem:[%s1375_s1 + $0x258] sm:$0xff]  ;;  %v129_v53 = vld [vmem:[%s1375_s1 + $0x350] sm:$0xff]  ;;  %v861_v54 = vpack.c.bf16 %v146_v47, %v145_v46  ;;  %v147_v58 = vld [vmem:[%s1375_s1 + $0x3e0] sm:$0xff]  ;;  %v833_v62 = vpack.c.bf16 %v116_v57, %v115_v56  ;;  %vm572_vm3 = vcmask 41984  }
  0x32   :  { %826 = vmatprep.subr.bf16.mxu0 %v825_v36  ;;  %v130_v55 = vld [vmem:[%s1375_s1 + $0x358] sm:$0xff]  ;;  %v148_v59 = vld [vmem:[%s1375_s1 + $0x3e8] sm:$0xff]  ;;  %v831_v60 = vpack.c.bf16 %v98_v52, %v97_v13  ;;  %v99_v63 = vld [vmem:[%s1375_s1 + $0x260] sm:$0xff]  ;;  %p894_p3 = por %p893_p2, %p892_p1 }
  0x33   :  { %856 = vmatpush3.bf16.msra.mxu1 %v855_v35  ;;  %476 = vmatprep.mubr.f32.mxu1 %v193_v49  ;;  %v863_v61 = vpack.c.bf16 %v130_v55, %v129_v53  ;;  %v100_v0 = vld [vmem:[%s1375_s1 + $0x268] sm:$0xff]  ;;  %v131_v1 = vld [vmem:[%s1375_s1 + $0x360] sm:$0xff]  ;;  %v865_v2 = vpack.c.bf16 %v148_v59, %v147_v58  ;;  %v117_v4 = vld [vmem:[%s1375_s1 + $0x2f0] sm:$0xff] }
  0x34   :  { %858 = vmatprep.subr.bf16.mxu1 %v857_v40  ;;  %v132_v3 = vld [vmem:[%s1375_s1 + $0x368] sm:$0xff]  ;;  %v118_v5 = vld [vmem:[%s1375_s1 + $0x2f8] sm:$0xff]  ;;  %v149_v6 = vld [vmem:[%s1375_s1 + $0x3f0] sm:$0xff]  ;;  %v835_v8 = vpack.c.bf16 %v100_v0, %v99_v63  ;;  %p895_p4 = pnand %p894_p3, %p888_p0 }
  0x35   :  { %828 = vmatpush3.bf16.msra.mxu0 %v827_v48  ;;  %v150_v7 = vld [vmem:[%s1375_s1 + $0x3f8] sm:$0xff]  ;;  %v867_v9 = vpack.c.bf16 %v132_v3, %v131_v1  ;;  %v837_v10 = vpack.c.bf16 %v118_v5, %v117_v4  ;;  %v101_v11 = vld [vmem:[%s1375_s1 + $0x270] sm:$0xff]  ;;  %v483_v19 = vld [vmem:[%s1377_s3] sm:$0xff] }
  0x36   :  { %830 = vmatprep.subr.bf16.mxu0 %v829_v51  ;;  %v102_v12 = vld [vmem:[%s1375_s1 + $0x278] sm:$0xff]  ;;  %v869_v14 = vpack.c.bf16 %v150_v7, %v149_v6  ;;  %v133_v15 = vld [vmem:[%s1375_s1 + $0x370] sm:$0xff]  ;;  %v484_v20 = vld [vmem:[%s1377_s3 + $0x8] sm:$0xff] }
  0x37   :  { %860 = vmatpush3.bf16.msra.mxu1 %v859_v50  ;;  %v134_v16 = vld [vmem:[%s1375_s1 + $0x378] sm:$0xff]  ;;  %v839_v17 = vpack.c.bf16 %v102_v12, %v101_v11  ;;  %v874_v22 = vpack.c.bf16 %v484_v20, %v483_v19  ;;  %v485_v24 = vld [vmem:[%s1377_s3 + $0x10] sm:$0xf]  ;;  %v588_v26 = vld [vmem:[%s1376_s2] ss:$0 sm:$0xff] }
  0x38   :  { %862 = vmatprep.subr.bf16.mxu1 %v861_v54  ;;  %v871_v18 = vpack.c.bf16 %v134_v16, %v133_v15  ;;  %v589_v43 = vld [vmem:[%s1378_s4] ss:$0 sm:$0xff] }
  0x39   :  { %832 = vmatpush3.bf16.msra.mxu0 %v831_v60 }
  0x3a   :  { %834 = vmatprep.subr.bf16.mxu0 %v833_v62 }
  0x3b   :  { %864 = vmatpush3.bf16.msra.mxu1 %v863_v61 }
  0x3c   :  { %866 = vmatprep.subr.bf16.mxu1 %v865_v2 }
  0x3d   :  { %836 = vmatpush3.bf16.msra.mxu0 %v835_v8 }
  0x3e   :  { %838 = vmatprep.subr.bf16.mxu0 %v837_v10 }
  0x3f   :  { %868 = vmatpush3.bf16.msra.mxu1 %v867_v9 }
  0x40   :  { %870 = vmatprep.subr.bf16.mxu1 %v869_v14 }
  0x41   :  { %840 = vmatpush3.bf16.msra.mxu0 %v839_v17 }
  0x42   :  { %873 = vmatprep.subr.bf16.mxu0 %v912_v21 }
  0x43   :  { %872 = vmatpush3.bf16.msra.mxu1 %v871_v18 }
  0x44   :  { %407 = vmatmul.mubr.f32.vlgmr.msra.gmra.mrb[2].mxu0 %v1257_v33 }
  0x45   :  { %742 = vmatprep.mubr.msk.f32.mxu0 %vm913_vm0, %v914_v23  ;;  %875 = vmatpush3.bf16.msra.mxu0 %v874_v22 }
  0x46   :  { %477 = vmatmul.mubr.f32.vlgmr.msra.gmra.mrb[2].mxu1 %v191_v45  ;;  %740 = vmatprep.subr.mxu0 %v914_v23 }
  0x49   :  { %741 = vmatpush3.msk.msra.mxu0 %vm497_vm1, %v485_v24 }
  0xf7   :  { %v624_v25 = vpop.f32.mrb[0].mxu0 }
  0xf8   :  { %v625_v27 = vpop.f32.mrb[1].mxu0 }
  0xf9   :  { %v659_v28 = vpop.f32.mrb[0].mxu1  ;;  %v626_v29 = vadd.f32 %v625_v27, %v624_v25 }
  0xfa   :  { %v660_v30 = vpop.f32.mrb[1].mxu1 }
  0xfb   :  { %v661_v31 = vadd.f32 %v660_v30, %v659_v28  ;;  %v269_v32 = vadd.f32 %v626_v29, %v588_v26 }
  0xfd   :  { %v339_v33 = vadd.f32 %v661_v31, %v269_v32 }
 0x117   :  { %v694_v34 = vpop.f32.mrb[2].mxu0 }
 0x118   :  { %v695_v35 = vpop.f32.mrb[3].mxu0 }
 0x119   :  { %v729_v36 = vpop.f32.mrb[2].mxu1  ;;  %v696_v37 = vadd.f32 %v695_v35, %v694_v34 }
 0x11a   :  { %v730_v38 = vpop.f32.mrb[3].mxu1 }
 0x11b   :  { %v731_v39 = vadd.f32 %v730_v38, %v729_v36  ;;  %v409_v40 = vadd.f32 %v696_v37, %v339_v33 }
 0x11d   :  { %v479_v41 = vadd.f32 %v731_v39, %v409_v40 }
 0x11f   :  { %883 = vtanh.f32 %v479_v41 }
 0x129   :  { %v884_v42 = vpop.eup %883 }
 0x12a   :  { %743 = vmatmul.mubr.msk.f32.vlgmr.msra.gmra.mrb[4].mxu0 %vm493_vm2, %v884_v42 }
 0x1fd   :  { %v567_v44 = vpop.f32.mrb[4].mxu0 }
 0x1fe   :  { %v568_v45 = vadd.f32 %v589_v43, %v567_v44  ;;  %v744_v46 = vpop.f32.mrb[5].mxu0 }
 0x200   :  { %885 = vtanh.f32 %v568_v45 }
 0x20a   :  { %v886_v47 = vpop.eup %885 }
 0x20b   :  { %573 = vst.msk [vmem:[#allocation2] sm:$0x3] %vm572_vm3, %v886_v47 }
 0x20c   :  { %898 = shalt.err (!%p895_p4)
}
 0x20d   :  { %s899_s4 = scalar_lea.hbm %s1379_s5, 32 }
 0x20e   :  { %p900_p5 = scmp.ne.s32.totalorder %s1379_s5, %s899_s4  ;;  %p903_p6 = scmp.lt.u32.totalorder %s899_s4, %s1379_s5 }
 0x210   :  { %p905_p7 = pnand %p903_p6, %p900_p5 }
 0x212   :  { %908 = shalt.err (!%p905_p7)
}
 0x213   :  { %583 = dma.vmem_to_hbm [thread:$0]  %s581_s8, 32, %s1379_s5, [#allocation3]  }
 0x214   :  { %909 = dma.done.wait [#allocation3], 32  }
 0x215   :  { %910 = vsyncadd [#allocation3], 4294967264 }
 0x216   :  { %587 = vsyncpa [#allocation3], 1 }

</bundles_post_ra>
